<compile_context>
chip_gen: v7x
topology: tpu7x:2x2x1
jax: 0.10.0
libtpu: 0.0.40
codegen_flags: <defaults>
</compile_context>

<pallas_src>
import jax
import jax.numpy as jnp
from jax.experimental import pallas as pl
from jax.experimental.pallas import tpu as pltpu


# --------------------------------------------------------------------------
# Kernels
# --------------------------------------------------------------------------
def _permute_0231_flat_kernel(x_ref, o_ref):
    """General path (any C): interleave channels into a lane-dense flat slab.

    x_ref: (tN, C, tHW)   lane-dense along spatial.
    o_ref: (tN, tHW * C)  lane-dense flat NHWC slab for the same tile.
    out[n, p*C + c] == in[n, c, p].
    """
    tN, C, tHW = x_ref.shape
    y = jnp.transpose(x_ref[...], (0, 2, 1))      # XLU minor-dim transpose
    o_ref[...] = y.reshape(tN, tHW * C)           # lane-dense store


def _permute_0231_3d_kernel(x_ref, o_ref):
    """Fast path (C % 128 == 0): both layouts already lane/tile aligned.

    x_ref: (tN, C, tHW)  ->  o_ref: (tN, tHW, C), no reshape needed.
    """
    o_ref[...] = jnp.transpose(x_ref[...], (0, 2, 1))


# --------------------------------------------------------------------------
# Tile policy
# --------------------------------------------------------------------------
def _sublane(dtype):
    """Minimum second-to-last-dim tile granularity for this dtype."""
    return {4: 8, 2: 16, 1: 32}.get(jnp.dtype(dtype).itemsize, 8)


def _spatial_tile(hw, c, itemsize, target_bytes):
    """Spatial tile: full extent if it fits the budget, otherwise the largest
    128-aligned tile within the budget (partial boundary blocks handled by a
    cdiv grid).  Hard-bounded: never silently returns a giant tile."""
    limit = max(1, target_bytes // max(c * itemsize, 1))
    if hw <= limit:
        return hw                       # full extent: always a legal block dim
    t = (limit // 128) * 128
    if t >= 128:
        return t                        # 128-aligned, fits budget
    return min(hw, 128)                 # minimal legal aligned tile


def _batch_tile(n, per_sample_bytes, target_bytes, sub):
    """Batch tile: full extent if it fits, else the largest sublane-aligned
    tile within the budget (dtype-aware granularity)."""
    budget = max(1, target_bytes // max(per_sample_bytes, 1))
    if n <= budget:
        return n                        # full extent: always legal
    t = (budget // sub) * sub
    if t >= sub:
        return t
    return min(n, sub)                  # minimal legal tile


# --------------------------------------------------------------------------
# Wrapper
# --------------------------------------------------------------------------
def _permute_0231(x, *, target_tile_bytes=4 << 20):
    """Pallas equivalent of Permute(dims=(0, 2, 3, 1)) for NCHW input."""
    N, C, H, W = x.shape
    HW = H * W
    itemsize = jnp.dtype(x.dtype).itemsize
    sub = _sublane(x.dtype)

    tHW = _spatial_tile(HW, C, itemsize, target_tile_bytes)
    tN = _batch_tile(N, C * tHW * itemsize, target_tile_bytes, sub)

    grid_n = pl.cdiv(N, tN)
    grid_s = pl.cdiv(HW, tHW)
    # Keep both v7x TensorCores busy when the natural tiling is a single tile.
    if grid_n * grid_s < 2 and tHW == HW and HW >= 256:
        tHW = ((((HW + 1) // 2) + 127) // 128) * 128
        grid_s = pl.cdiv(HW, tHW)

    tile_bytes = tN * C * tHW * itemsize
    # in + out double-buffered plus in-kernel relayout scratch, with slack;
    # clamp to 48 MiB so it is safe even on v7x's 64 MiB physical VMEM.
    vmem_limit = int(min(max(8 * tile_bytes + (2 << 20), 32 << 20), 48 << 20))

    cost = pl.CostEstimate(flops=0, transcendentals=0,
                           bytes_accessed=2 * N * C * HW * itemsize)
    cparams = pltpu.CompilerParams(
        dimension_semantics=("parallel", "parallel"),
        vmem_limit_bytes=vmem_limit,
    )

    # Contiguous (free) reshape so the input's last dim is lane-dense.
    x2 = x.reshape(N, C, HW)
    in_spec = pl.BlockSpec((tN, C, tHW), lambda n, s: (n, 0, s))

    if C % 128 == 0:
        # Fast path: channels already lane-aligned; store the transposed tile
        # directly into a 3-D (N, HW, C) output -- no minor-dim merge at all.
        out = pl.pallas_call(
            _permute_0231_3d_kernel,
            out_shape=jax.ShapeDtypeStruct((N, HW, C), x.dtype),
            grid_spec=pltpu.PrefetchScalarGridSpec(
                num_scalar_prefetch=0,
                grid=(grid_n, grid_s),
                in_specs=[in_spec],
                out_specs=pl.BlockSpec((tN, tHW, C), lambda n, s: (n, s, 0)),
            ),
            compiler_params=cparams,
            cost_estimate=cost,
        )(x2)
        return out.reshape(N, H, W, C)

    # General path: flat lane-dense output slab; spatial tile s of sample n
    # occupies the contiguous flat range [s*tHW*C, (s+1)*tHW*C).
    out_flat = pl.pallas_call(
        _permute_0231_flat_kernel,
        out_shape=jax.ShapeDtypeStruct((N, HW * C), x.dtype),
        grid_spec=pltpu.PrefetchScalarGridSpec(
            num_scalar_prefetch=0,
            grid=(grid_n, grid_s),
            in_specs=[in_spec],
            out_specs=pl.BlockSpec((tN, tHW * C), lambda n, s: (n, s)),
        ),
        compiler_params=cparams,
        cost_estimate=cost,
    )(x2)
    return out_flat.reshape(N, H, W, C)


def permute(x, dims):
    """Forward pass of the Permute module: x.permute(*dims).contiguous()."""
    dims = tuple(int(d) for d in dims)
    if dims == tuple(range(x.ndim)):
        return x
    if x.ndim == 4 and dims == (0, 2, 3, 1):
        return _permute_0231(x)
    # TODO(synk): permutations other than NCHW->NHWC have no bespoke Pallas
    # kernel; fall back to XLA's transpose.
    return jnp.transpose(x, dims)


# --------------------------------------------------------------------------
# Demo / self-check
# --------------------------------------------------------------------------
if __name__ == "__main__":
    key = jax.random.PRNGKey(0)
    k1, k2 = jax.random.split(key)

    # Canonical bindsnet case: small NCHW conv feature map (general path, C=4).
    x = jax.random.normal(k1, (2, 4, 16, 16), dtype=jnp.float32)
    y = jax.block_until_ready(permute(x, (0, 2, 3, 1)))
    ref = jnp.transpose(x, (0, 2, 3, 1))
    assert y.shape == ref.shape and y.dtype == ref.dtype
    assert jnp.array_equal(y, ref), "flat-path permute does not match reference"

    # Fast path: lane-aligned channel count (C % 128 == 0).
    x128 = jax.random.normal(k2, (2, 128, 8, 8), dtype=jnp.float32)
    y128 = jax.block_until_ready(permute(x128, (0, 2, 3, 1)))
    ref128 = jnp.transpose(x128, (0, 2, 3, 1))
    assert y128.shape == ref128.shape and y128.dtype == ref128.dtype
    assert jnp.array_equal(y128, ref128), "3d-path permute does not match reference"

    print("KERNEL_OK")
</pallas_src>

<mosaic_0001>
module attributes {stable_mosaic.version = 11 : i64} {
  func.func @_permute_0231_flat_kernel(%arg0: i32, %arg1: i32, %arg2: memref<2x4x128xf32, #tpu.memory_space<vmem>>, %arg3: memref<2x512xf32, #tpu.memory_space<vmem>>) attributes {dimension_semantics = [#tpu.dimension_semantics<parallel>, #tpu.dimension_semantics<parallel>], iteration_bounds = array<i64: 1, 2>, scalar_prefetch = 0 : i64, scratch_operands = 0 : i64, tpu.core_type = #tpu.core_type<tc>, window_params = [{transform_indices = @transform_0, window_bounds = array<i64: 2, 4, 128>}, {transform_indices = @transform_1, window_bounds = array<i64: 2, 512>}]} {
    %c0 = arith.constant 0 : index
    %c0_0 = arith.constant 0 : index
    %c0_1 = arith.constant 0 : index
    %0 = vector.load %arg2[%c0, %c0_0, %c0_1] : memref<2x4x128xf32, #tpu.memory_space<vmem>>, vector<2x4x128xf32>
    %1 = tpu.transpose %0, [0, 2, 1] : vector<2x4x128xf32> -> vector<2x128x4xf32>
    %2 = vector.shape_cast %1 : vector<2x128x4xf32> to vector<2x512xf32>
    %c0_2 = arith.constant 0 : index
    %c0_3 = arith.constant 0 : index
    %3 = vector.load %arg3[%c0_2, %c0_3] : memref<2x512xf32, #tpu.memory_space<vmem>>, vector<2x512xf32>
    tpu.vector_store %arg3[%c0_2, %c0_3], %2 {strides = array<i32>} : memref<2x512xf32, #tpu.memory_space<vmem>>, vector<2x512xf32>,
    return
  }
  func.func @transform_0(%arg0: i32, %arg1: i32) -> (i32, i32, i32) {
    %c0_i32 = arith.constant 0 : i32
    %c0_i32_0 = arith.constant 0 : i32
    return %arg0, %c0_i32, %arg1 : i32, i32, i32
  }
  func.func @transform_1(%arg0: i32, %arg1: i32) -> (i32, i32) {
    %c0_i32 = arith.constant 0 : i32
    return %arg0, %arg1 : i32, i32
  }
}

</mosaic_0001>

<bundles_post_ra>
// kernel: tpu_custom_call.1
= control target key start
LH: loop header
LB: loop body
LE: loop exit
PB: predicated region body
PF: predicated region fallthrough
CT: control target
= control target key end

     0   :  { %6 = vsyncpa [#allocation3], 0  ;;  %s3419_s0 = inlined_call_operand.hbm [shape: f32[2,4,256], index: 0, kind: input, shape index: {}]   ;;  %s3420_s1 = inlined_call_operand.hbm [shape: f32[2,1024], index: 1, kind: output, shape index: {}]  }
   0x1   :  { %8 = vsyncpa [#allocation3 + $0x1], 0 }
   0x2   :  { %9 = vsyncpa [#allocation4], 0 }
   0x3   :  { %11 = vsyncpa [#allocation4 + $0x1], 0  ;;  %s2328_s6 = smov 0   ;;  %s2330_s7 = smov 0  }
   0x4   :  { %s2332_s8 = smov 0   ;;  %s2334_s9 = smov 0  }
   0x5   :  { %s2336_s10 = smov 0   ;;  %s2338_s11 = smov 0  }
   0x6 LB: > { %s2051_s12 = sadd.s32 4294967295, %s2277_s11   ;;  %s2052_s13 = sadd.s32 4294967294, %s2277_s11   ;;  %s2277_s11 = sphi %s2338_s11, %s17_s11   ;;  %s2273_s10 = sphi %s2336_s10, %s3573_s10   ;;  %s2269_s9 = sphi %s2334_s9, %s3572_s9   ;;  %s2265_s8 = sphi %s2332_s8, %s3571_s8   ;;  %s2261_s7 = sphi %s2330_s7, %s3570_s7   ;;  %s2257_s6 = sphi %s2328_s6, %s3569_s6  }
   0x7   : > { %s26_s14 = sadd.s32 1, %s2273_s10  ;;  %s38_s15 = sadd.s32 1, %s2265_s8 }
   0x8   : > { %p27_p0 = scmp.ge.s32.totalorder %s26_s14, 2  ;;  %p45_p1 = scmp.ne.s32.totalorder %s2265_s8, %s2261_s7 }
   0x9   : > { %p46_p2 = scmp.eq.s32.totalorder %s2277_s11, 0  ;;  %p51_p3 = scmp.ne.s32.totalorder %s2261_s7, %s2257_s6 }
   0xa   : > { %s3575_s14 = smov (%p27_p0, %s26_s14), 0  ;;  %p52_p5 = scmp.eq.s32.totalorder %s2051_s12, 0 }
   0xb   : > { %p2369_p4 = por %p46_p2, %p45_p1  ;;  %s34_s17 = ssub.s32 %s2273_s10, %s3575_s14 }
   0xc   : > { %p77_p6 = scmp.eq.s32.totalorder %s2051_s12, 1  ;;  %p36_p7 = scmp.eq.s32.totalorder %s34_s17, 0 }
   0xd   : > { %p2375_p8 = por %p52_p5, %p51_p3  ;;  %p83_p10 = scmp.eq.s32.totalorder %s2052_s13, 1 }
   0xe   : > { %p2379_p9 = por %p77_p6, %p45_p1  ;;  %p2078_p13 = scmp.lt.s32.totalorder %s2277_s11, 2 }
   0xf   : > { %s2384_s20 = scalar_select %p36_p7, %s2265_s8, %s38_s15  }
  0x10   : > { %s3489_s19 = scalar_select %p2379_p9, 1, 0 }
  0x11   : > { %p2386_p11 = por %p83_p10, %p51_p3  ;;  %s103_s22 = sand.u32 1, %s2265_s8  }
  0x12   : > { %s2055_s23 = sshll.u32 %s103_s22, 3  ;;  %s2056_s24 = sshll.u32 %s2273_s10, 6 }
  0x13   : > { %s3490_s21 = scalar_select %p2386_p11, 1, 0 }
  0x14   : > { %s2397_s27 = scalar_lea.hbm %s3419_s0, %s2056_s24  ;;  %s107_s28 = scalar_lea.vmem [#allocation2], %s2055_s23 }
  0x15   : > { %s116_s29 = sshll.u32 %s107_s28, 4  ;;  %p2403_p0 = pnand %p2078_p13, %p2369_p4  ;;  %s2399_s29 = int_to_ptr.vmem [resolvable:$true] %s116_s29 }
  0x16   : > { %s2407_s2 = scalar_lea.sflag [#allocation3], %s103_s22  ;;  %s2165_s3 = scalar_lea.hbm %s2397_s27, 128 }
  0x17   : > { %p2166_p1 = scmp.ne.s32.totalorder %s2397_s27, %s2165_s3  ;;  %p2167_p2 = pneg %p2403_p0 }
  0x18   : > { %s2170_s12 = scalar_lea.hbm %s3419_s0, 256  ;;  %p2171_p4 = scmp.lt.u32.totalorder %s2397_s27, %s3419_s0 }
  0x19   : > { %p2168_p3 = pnand %p2167_p2, %p2166_p1  ;;  %p2172_p6 = scmp.lt.u32.totalorder %s2170_s12, %s2165_s3 }
  0x1a   : > { %p2174_p10 = scmp.lt.u32.totalorder %s2165_s3, %s2397_s27 }
  0x1b   : > { %p2169_p5 = pneg %p2168_p3  ;;  %p2173_p7 = por %p2172_p6, %p2171_p4 }
  0x1d   : > { %p2175_p13 = por %p2174_p10, %p2173_p7 }
  0x1f   : > { %p2176_p12 = pnand %p2175_p13, %p2169_p5 }
  0x21   : > { %2179 = shalt.err (!%p2176_p12)
}
  0x22   : > { %s2180_s16 = scalar_lea.vmem %s2399_s29, 128  ;;  %s2279_s17 = smov [#allocation2]  }
  0x23   : > { %p2181_p1 = scmp.ne.s32.totalorder %s2399_s29, %s2180_s16  ;;  %s2185_s22 = sshll.u32 %s2279_s17, 4  ;;  %s2186_s22 = int_to_ptr.vmem [resolvable:$false] %s2185_s22 }
  0x24   : > { %s2187_s23 = scalar_lea.vmem %s2186_s22, 256  ;;  %p2188_p9 = scmp.lt.s32.totalorder %s2399_s29, %s2186_s22 }
  0x25   : > { %p2183_p3 = pnand %p2181_p1, %p2167_p2  ;;  %p2189_p4 = scmp.lt.s32.totalorder %s2187_s23, %s2180_s16 }
  0x27   : > { %p2184_p11 = pneg %p2183_p3  ;;  %p2190_p6 = por %p2189_p4, %p2188_p9 }
  0x29   : > { %p2191_p7 = pnand %p2190_p6, %p2184_p11 }
  0x2b   : > { %2194 = shalt.err (!%p2191_p7)
}
  0x2c   : > { %s2280_s24 = smov 128   ;;  %s2281_s25 = smov 64  }
  0x2d   : > { %s2282_s26 = smov 4   ;;  %p2057_p12 = scmp.ge.s32.totalorder %s2277_s11, 1 }
  0x2e   : > { %2073 = dma.hbm_to_vmem [thread:$0]  (!%p2403_p0), %s2397_s27, 128, %s2399_s29, %s2407_s2, %s2280_s24, %s2281_s25, %s2282_s26  }
  0x2f   : > { %p124_p2 = scmp.lt.s32.totalorder %s2277_s11, 3 }
  0x31   : > { %p125_p5 = pnand %p2057_p12, %p124_p2 }
  0x33   : > { %128 = sbr.rel (%p125_p5) target bundleno = 722 (0x2d2), region = 24 }
  0x3a   : > { %s2438_s28 = sand.u32 1, %s2261_s7  }
  0x3b   : > { %s3422_s3 = sshll.u32 %s2438_s28, 3  ;;  %s131_s4 = scalar_lea.sflag [#allocation3], %s2438_s28 }
  0x3c   : > { %s134_s5 = scalar_lea.vmem [#allocation2], %s3422_s3 }
  0x3d   : > { %2248 = dma.done.wait (%p2375_p8), %s131_s4, 128  }
  0x3e   : > { %2250 = vsyncadd (%p2375_p8), %s131_s4, 4294967168  ;;  %v155_v0 = vld [vmem:[%s134_s5] sm:$0xf]  ;;  %v156_v1 = vld [vmem:[%s134_s5 + $0x4] sm:$0xf]  ;;  %v225_v18 = vlaneseq  ;;  %v2285_v34 = vmov 0.0  }
  0x3f   : > { %157 = vxpose.xlu0.b32.start.end [1/1] (short) %v155_v0, 128  ;;  %v2283_v16 = vmov 1983009808   ;;  %v2284_v22 = vmov 1934713408   ;;  %s2286_s18 = smov 8   ;;  %s3450_s27 = smov 4  }
  0x40   : > { %v223_v17 = vunpack.c.l.s4 %v2283_v16  ;;  %v226_v21 = vshrl.u32 %v225_v18, 7  ;;  %v254_v23 = vunpack.c.l.s4 %v2284_v22  ;;  %s3435_s29 = smov 12   ;;  %s3433_s30 = smov 72   ;;  %vm1773_vm0 = vcmask 31744  }
  0x41   : > { %s2290_s2 = smov 16   ;;  %s2291_s12 = smov 24   ;;  %vm1775_vm1 = vcmask 64512   ;;  %vm1777_vm2 = vcmask 97280   ;;  %vm1779_vm3 = vcmask 130048   ;;  %vm1781_vm4 = vcmask 162816  }
  0x42   : > { %v224_v20 = vunpack.c.0.s8 %v223_v17  ;;  %v255_v26 = vunpack.c.0.s8 %v254_v23  ;;  %s3429_s13 = smov 20   ;;  %s3427_s15 = smov 28   ;;  %vm1783_vm5 = vcmask 195584   ;;  %vm1785_vm6 = vcmask 228352  }
  0x43   : > { %s3431_s16 = smov 52   ;;  %s2295_s17 = smov 32   ;;  %vm3469_vm7 = vcmask 261120   ;;  %vm3468_vm8 = vcmask 293888   ;;  %vm1791_vm9 = vcmask 326656   ;;  %vm1793_vm10 = vcmask 359424  }
  0x44   : > { %v2478_v25 = vsub.s32 %v224_v20, %v226_v21  ;;  %v2482_v30 = vsub.s32 %v255_v26, %v226_v21  ;;  %s3449_s22 = smov 60   ;;  %s2297_s23 = smov 40   ;;  %vm3470_vm11 = vcmask 392192   ;;  %vm3471_vm12 = vcmask 424960  }
  0x45   : > { %s3437_s24 = smov 68   ;;  %s3425_s25 = smov 36   ;;  %vm3472_vm13 = vcmask 457728   ;;  %vm3473_vm14 = vcmask 490496   ;;  %vm3475_vm15 = vcmask 523264  }
  0x46   : > { %3492 = vst [vmem:[#allocation8_spill] sm:$0xff] %v2478_v25  ;;  %s3439_s26 = smov 76   ;;  %s3423_s4 = smov 44  }
  0x47   : > { %s3456_s5 = smov 84   ;;  %s2303_s3 = smov 48  }
  0x48   : > { %p3566_p9 = scmp.ne.s32.totalorder %s3489_s19, 0 }
  0x7c   : > { %189 = vxpose.xlu0.b32.start.end [1/1] (short) %v156_v1, 128 }
  0xbf   : > { %v173_v2 = vpop.trf.xlu0 }
  0xc0   : > { %v228_v28 = vrot.slane %v173_v2, %v2478_v25  ;;  %v221_v38 = vcombine.high %v173_v2, %v2285_v34 }
  0xc2   : > { %v235_v44 = vrot.slane %v221_v38, %v2478_v25 }
  0xc3   : > { %v2448_v3 = vpop.trf.xlu0 }
  0xc4   : > { %v294_v1 = vrot.slane %v2448_v3, %v2478_v25 }
  0xc7   : > { %v2450_v4 = vpop.trf.xlu0 }
  0xc8   : > { %v2497_v40 = vrot.slane %v2450_v4, %v2478_v25 }
  0xcb   : > { %v2452_v5 = vpop.trf.xlu0 }
  0xcf   : > { %v2454_v6 = vpop.trf.xlu0 }
  0xd3   : > { %v2456_v7 = vpop.trf.xlu0 }
  0xd4   : > { %v551_v53 = vcombine.high %v2456_v7, %v2285_v34 }
  0xd6   : > { %v565_v57 = vrot.slane %v551_v53, %v2478_v25 }
  0xd7   : > { %v2458_v8 = vpop.trf.xlu0 }
  0xd8   : > { %v624_v16 = vrot.slane %v2458_v8, %v2478_v25 }
  0xdb   : > { %v2460_v9 = vpop.trf.xlu0 }
  0xdf   : > { %v2462_v10 = vpop.trf.xlu0 }
  0xe3   : > { %v2464_v11 = vpop.trf.xlu0 }
  0xe7   : > { %v2466_v12 = vpop.trf.xlu0 }
  0xeb   : > { %v2468_v13 = vpop.trf.xlu0 }
  0xef   : > { %v2470_v14 = vpop.trf.xlu0 }
  0xf3   : > { %v2472_v15 = vpop.trf.xlu0 }
  0xf7   : > { %v2474_v19 = vpop.trf.xlu0 }
  0xfb   : > { %v2476_v24 = vpop.trf.xlu0 }
  0xff   : > { %v205_v27 = vpop.trf.xlu0 }
 0x100   : > { %v243_v29 = vrot.slane %v205_v27, %v2478_v25  ;;  %v236_v35 = vcombine.high %v205_v27, %v2285_v34  ;;  %v617_v27 = vcombine.high %v2458_v8, %v2285_v34 }
 0x102   : > { %v251_v31 = vcombine.low %v228_v28, %v243_v29  ;;  %v252_v32 = vcombine.high %v228_v28, %v243_v29  ;;  %v250_v41 = vrot.slane %v236_v35, %v2478_v25  ;;  %v2557_v28 = vrot.slane %v2462_v10, %v2478_v25 }
 0x103   : > { %v2484_v33 = vpop.trf.xlu0 }
 0x104   : > { %v266_v36 = vrot.slane %v252_v32, %v2482_v30  ;;  %v2489_v37 = vrot.slane %v251_v31, %v2482_v30  ;;  %v267_v49 = vcombine.low %v235_v44, %v250_v41  ;;  %v268_v52 = vcombine.high %v235_v44, %v250_v41 }
 0x105   : > { %v309_v60 = vrot.slane %v2484_v33, %v2478_v25  ;;  %v302_v31 = vcombine.high %v2484_v33, %v2285_v34  ;;  %v287_v44 = vcombine.high %v2448_v3, %v2285_v34 }
 0x106   : > { %1282 = vrot.lane.b32.xlu1 %v266_v36, %s2286_s18  ;;  %v283_v43 = vcombine.high %v2489_v37, %v2285_v34  ;;  %v284_v47 = vcombine.high %v266_v36, %v2285_v34  ;;  %v275_v51 = vrot.slane %v267_v49, %v2482_v30  ;;  %v282_v56 = vrot.slane %v268_v52, %v2482_v30 }
 0x107   : > { %v2493_v39 = vpop.trf.xlu0  ;;  %v317_v18 = vcombine.low %v294_v1, %v309_v60  ;;  %v318_v32 = vcombine.high %v294_v1, %v309_v60  ;;  %v881_v49 = vcombine.high %v2466_v12, %v2285_v34  ;;  %v2591_v52 = vrot.slane %v302_v31, %v2478_v25 }
 0x108   : > { %v2502_v42 = vrot.slane %v2493_v39, %v2478_v25  ;;  %v285_v62 = vcombine.high %v275_v51, %v2285_v34  ;;  %v286_v20 = vcombine.high %v282_v56, %v2285_v34  ;;  %v888_v60 = vrot.slane %v2466_v12, %v2478_v25 }
 0x109   : > { %v325_v36 = vrot.slane %v317_v18, %v2482_v30  ;;  %v332_v3 = vrot.slane %v318_v32, %v2482_v30  ;;  %v954_v12 = vrot.slane %v2468_v13, %v2478_v25 }
 0x10a   : > { %v384_v45 = vcombine.high %v2497_v40, %v2502_v42  ;;  %1278 = vrot.lane.b32.xlu1 %v283_v43, %s3450_s27 }
 0x10b   : > { %v2510_v46 = vpop.trf.xlu0  ;;  %v349_v18 = vcombine.high %v325_v36, %v2285_v34 }
 0x10c   : > { %v2514_v48 = vrot.slane %v384_v45, %v2482_v30  ;;  %v631_v45 = vrot.slane %v617_v27, %v2478_v25 }
 0x10e   : > { %1286 = vrot.lane.b32.xlu1 %v284_v47, %s3435_s29  ;;  %1346 = vrot.lane.b32.xlu0 %v2514_v48, %s3433_s30  ;;  %s2309_s30 = smov 64   ;;  %s3452_s29 = smov 124  }
 0x10f   : > { %v2519_v50 = vpop.trf.xlu0 }
 0x112   : > { %1290 = vrot.lane.b32.xlu1 %v275_v51, %s2290_s2 }
 0x113   : > { %v2525_v54 = vpop.trf.xlu0 }
 0x114   : > { %v566_v55 = vcombine.high %v2525_v54, %v2285_v34 }
 0x116   : > { %v580_v58 = vrot.slane %v566_v55, %v2478_v25  ;;  %1298 = vrot.lane.b32.xlu1 %v282_v56, %s2291_s12 }
 0x117   : > { %v211_v59 = vpop.trf.xlu0 }
 0x118   : > { %v597_v61 = vcombine.low %v565_v57, %v580_v58  ;;  %v598_v63 = vcombine.high %v565_v57, %v580_v58  ;;  %v639_v0 = vrot.slane %v211_v59, %v2478_v25  ;;  %v632_v21 = vcombine.high %v211_v59, %v2285_v34 }
 0x119   : > { %v2599_v57 = vrot.slane %v287_v44, %v2478_v25  ;;  %v2603_v58 = vcombine.high %v2460_v9, %v2285_v34  ;;  %v2607_v59 = vrot.slane %v2460_v9, %v2478_v25  ;;  %v895_v9 = vrot.slane %v881_v49, %v2478_v25 }
 0x11a   : > { %1294 = vrot.lane.b32.xlu1 %v285_v62, %s3429_s13  ;;  %v2541_v2 = vrot.slane %v597_v61, %v2482_v30  ;;  %v647_v22 = vcombine.low %v624_v16, %v639_v0  ;;  %v2550_v26 = vrot.slane %v598_v63, %v2482_v30  ;;  %v646_v8 = vrot.slane %v632_v21, %v2478_v25  ;;  %s3459_s13 = smov 108  }
 0x11b   : > { %v212_v17 = vpop.trf.xlu0  ;;  %v648_v38 = vcombine.high %v624_v16, %v639_v0  ;;  %v947_v61 = vcombine.high %v2468_v13, %v2285_v34  ;;  %v2650_v49 = vrot.slane %v2470_v14, %v2478_v25 }
 0x11c   : > { %v615_v23 = vcombine.high %v2541_v2, %v2285_v34  ;;  %v616_v41 = vcombine.high %v2550_v26, %v2285_v34  ;;  %v2573_v43 = vrot.slane %v647_v22, %v2482_v30  ;;  %v663_v53 = vcombine.low %v631_v45, %v646_v8 }
 0x11d   : > { %v2596_v56 = vrot.slane %v648_v38, %v2482_v30  ;;  %v664_v62 = vcombine.high %v631_v45, %v646_v8  ;;  %v2615_v63 = vrot.slane %v212_v17, %v2478_v25  ;;  %v333_v22 = vcombine.low %v2599_v57, %v2591_v52 }
 0x11e   : > { %1302 = vrot.lane.b32.xlu1 %v286_v20, %s3427_s15  ;;  %1450 = vrot.lane.b32.xlu0 %v615_v23, %s3431_s16  ;;  %v679_v55 = vcombine.high %v2573_v43, %v2285_v34  ;;  %v2627_v21 = vrot.slane %v663_v53, %v2482_v30  ;;  %v698_v23 = vcombine.high %v212_v17, %v2285_v34  ;;  %s3460_s15 = smov 100  }
 0x11f   : > { %v2560_v29 = vpop.trf.xlu0  ;;  %v680_v20 = vcombine.high %v2596_v56, %v2285_v34  ;;  %v961_v13 = vrot.slane %v947_v61, %v2478_v25  ;;  %v350_v38 = vcombine.high %v332_v3, %v2285_v34  ;;  %v2640_v17 = vrot.slane %v664_v62, %v2482_v30 }
 0x120   : > { %v2566_v35 = vrot.slane %v2560_v29, %v2478_v25  ;;  %v341_v61 = vrot.slane %v333_v22, %v2482_v30  ;;  %v334_v62 = vcombine.high %v2599_v57, %v2591_v52 }
 0x121   : > { %v682_v52 = vcombine.high %v2640_v17, %v2285_v34 }
 0x122   : > { %v779_v33 = vcombine.low %v2557_v28, %v2566_v35  ;;  %1306 = vrot.lane.b32.xlu1 %v325_v36, %s2295_s17  ;;  %1458 = vrot.lane.b32.xlu0 %v616_v41, %s3449_s22  ;;  %v713_v36 = vcombine.low %v2607_v59, %v2615_v63 }
 0x123   : > { %v2582_v47 = vpop.trf.xlu0 }
 0x124   : > { %v2587_v51 = vrot.slane %v779_v33, %v2482_v30  ;;  %v2677_v57 = vrot.slane %v713_v36, %v2482_v30 }
 0x126   : > { %3493 = vst [vmem:[#allocation9_spill] sm:$0xff] %v2587_v51  ;;  %1314 = vrot.lane.b32.xlu1 %v332_v3, %s2297_s23  ;;  %1466 = vrot.lane.b32.xlu0 %v679_v55, %s3437_s24  ;;  %v681_v3 = vcombine.high %v2627_v21, %v2285_v34 }
 0x127   : > { %v215_v0 = vpop.trf.xlu0 }
 0x128   : > { %v896_v1 = vcombine.high %v215_v0, %v2285_v34  ;;  %v903_v16 = vrot.slane %v215_v0, %v2478_v25 }
 0x12a   : > { %v910_v27 = vrot.slane %v896_v1, %v2478_v25  ;;  %v911_v31 = vcombine.low %v888_v60, %v903_v16  ;;  %v912_v32 = vcombine.high %v888_v60, %v903_v16  ;;  %1310 = vrot.lane.b32.xlu1 %v349_v18, %s3425_s25  ;;  %1474 = vrot.lane.b32.xlu0 %v680_v20, %s3439_s26  ;;  %s2305_s25 = smov 56  }
 0x12b   : > { %v216_v8 = vpop.trf.xlu0  ;;  %v712_v60 = vrot.slane %v698_v23, %v2478_v25 }
 0x12c   : > { %v2643_v41 = vrot.slane %v911_v31, %v2482_v30  ;;  %v2646_v44 = vrot.slane %v912_v32, %v2482_v30  ;;  %v927_v33 = vcombine.low %v895_v9, %v910_v27  ;;  %v928_v45 = vcombine.high %v895_v9, %v910_v27 }
 0x12d   : > { %v962_v53 = vcombine.high %v216_v8, %v2285_v34  ;;  %v969_v55 = vrot.slane %v216_v8, %v2478_v25  ;;  %v714_v9 = vcombine.high %v2607_v59, %v2615_v63  ;;  %v697_v32 = vrot.slane %v2603_v58, %v2478_v25 }
 0x12e   : > { %1318 = vrot.lane.b32.xlu1 %v350_v38, %s3423_s4  ;;  %v2662_v0 = vrot.slane %v927_v33, %v2482_v30  ;;  %1482 = vrot.lane.b32.xlu0 %v681_v3, %s3456_s5  ;;  %v2680_v59 = vrot.slane %v928_v45, %v2482_v30  ;;  %s3443_s4 = smov 92   ;;  %v745_v33 = vcombine.high %v2677_v57, %v2285_v34 }
 0x12f   : > { %v976_v1 = vrot.slane %v962_v53, %v2478_v25  ;;  %v977_v16 = vcombine.low %v954_v12, %v969_v55  ;;  %v978_v18 = vcombine.high %v954_v12, %v969_v55  ;;  %v2668_v20 = vpop.trf.xlu0  ;;  %v729_v38 = vcombine.low %v697_v32, %v712_v60 }
 0x130   : > { %v2672_v22 = vrot.slane %v2668_v20, %v2478_v25  ;;  %v2704_v45 = vrot.slane %v714_v9, %v2482_v30  ;;  %v351_v53 = vcombine.high %v341_v61, %v2285_v34  ;;  %v730_v55 = vcombine.high %v697_v32, %v712_v60 }
 0x131   : > { %v2683_v63 = vrot.slane %v977_v16, %v2482_v30  ;;  %v2686_v12 = vrot.slane %v978_v18, %v2482_v30  ;;  %v993_v23 = vcombine.low %v961_v13, %v976_v1  ;;  %v994_v27 = vcombine.high %v961_v13, %v976_v1 }
 0x132   : > { %v1043_v31 = vcombine.low %v2650_v49, %v2672_v22  ;;  %1322 = vrot.lane.b32.xlu1 %v341_v61, %s2303_s3  ;;  %1490 = vrot.lane.b32.xlu0 %v682_v52, %s3443_s4  ;;  %v348_v13 = vrot.slane %v334_v62, %v2482_v30  ;;  %v746_v3 = vcombine.high %v2704_v45, %v2285_v34 }
 0x133   : > { %v2695_v36 = vrot.slane %v993_v23, %v2482_v30  ;;  %v2707_v58 = vrot.slane %v994_v27, %v2482_v30  ;;  %v2715_v62 = vrot.slane %v729_v38, %v2482_v30  ;;  %v383_v9 = vcombine.low %v2497_v40, %v2502_v42 }
 0x134   : > { %v2698_v8 = vrot.slane %v1043_v31, %v2482_v30  ;;  %v352_v1 = vcombine.high %v348_v13, %v2285_v34  ;;  %v764_v61 = vcombine.high %v2560_v29, %v2285_v34  ;;  %v2727_v16 = vrot.slane %v730_v55, %v2482_v30 }
 0x135   : > { %3495 = vst [vmem:[#allocation11_spill] sm:$0xff] %v2707_v58  ;;  %v747_v60 = vcombine.high %v2715_v62, %v2285_v34  ;;  %v749_v18 = vcombine.high %v2462_v10, %v2285_v34  ;;  %v368_v40 = vcombine.high %v2493_v39, %v2285_v34  ;;  %v391_v42 = vrot.slane %v383_v9, %v2482_v30 }
 0x136   : > { %3494 = vst [vmem:[#allocation10_spill] sm:$0xff] %v2698_v8  ;;  %1330 = vrot.lane.b32.xlu1 %v348_v13, %s2305_s25  ;;  %1498 = vrot.lane.b32.xlu0 %v745_v33, %s3460_s15  ;;  %v778_v29 = vrot.slane %v764_v61, %v2478_v25  ;;  %v780_v52 = vcombine.high %v2557_v28, %v2566_v35 }
 0x137   : > { %v748_v23 = vcombine.high %v2727_v16, %v2285_v34  ;;  %v353_v27 = vcombine.high %v2450_v4, %v2285_v34  ;;  %v763_v10 = vrot.slane %v749_v18, %v2478_v25  ;;  %v382_v39 = vrot.slane %v368_v40, %v2478_v25 }
 0x138   : > { %v415_v31 = vcombine.high %v391_v42, %v2285_v34  ;;  %v2749_v28 = vrot.slane %v780_v52, %v2482_v30  ;;  %v416_v4 = vcombine.high %v2514_v48, %v2285_v34  ;;  %v837_v38 = vrot.slane %v2582_v47, %v2478_v25 }
 0x139   : > { %v795_v35 = vcombine.low %v763_v10, %v778_v29  ;;  %v367_v32 = vrot.slane %v353_v27, %v2478_v25  ;;  %v822_v55 = vrot.slane %v2464_v11, %v2478_v25  ;;  %v830_v48 = vcombine.high %v2582_v47, %v2285_v34 }
 0x13a   : > { %1326 = vrot.lane.b32.xlu1 %v351_v53, %s3431_s16  ;;  %1506 = vrot.lane.b32.xlu0 %v746_v3, %s3459_s13  ;;  %s3461_s16 = smov 116   ;;  %v796_v53 = vcombine.high %v763_v10, %v778_v29  ;;  %v426_v10 = vrot.slane %v2452_v5, %v2478_v25 }
 0x13b   : > { %v399_v13 = vcombine.low %v367_v32, %v382_v39  ;;  %v2760_v33 = vrot.slane %v795_v35, %v2482_v30  ;;  %v400_v9 = vcombine.high %v367_v32, %v382_v39  ;;  %v844_v40 = vrot.slane %v830_v48, %v2478_v25 }
 0x13c   : > { %v2771_v61 = vrot.slane %v796_v53, %v2482_v30  ;;  %v1028_v32 = vcombine.high %v2668_v20, %v2285_v34 }
 0x13d   : > { %v407_v3 = vrot.slane %v399_v13, %v2482_v30  ;;  %v414_v18 = vrot.slane %v400_v9, %v2482_v30  ;;  %v1013_v13 = vcombine.high %v2470_v14, %v2285_v34  ;;  %v434_v14 = vcombine.high %v2510_v46, %v2285_v34 }
 0x13e   : > { %1334 = vrot.lane.b32.xlu1 %v352_v1, %s3449_s22  ;;  %1514 = vrot.lane.b32.xlu0 %v747_v60, %s3461_s16  ;;  %v845_v1 = vcombine.low %v822_v55, %v837_v38  ;;  %v815_v60 = vcombine.high %v2464_v11, %v2285_v34  ;;  %v441_v11 = vrot.slane %v2510_v46, %v2478_v25 }
 0x13f   : > { %v417_v52 = vcombine.high %v407_v3, %v2285_v34  ;;  %v1027_v9 = vrot.slane %v1013_v13, %v2478_v25 }
 0x140   : > { %v2781_v47 = vrot.slane %v845_v1, %v2482_v30  ;;  %v829_v29 = vrot.slane %v815_v60, %v2478_v25  ;;  %v449_v39 = vcombine.low %v426_v10, %v441_v11  ;;  %v218_v60 = vpop.trf.xlu0 }
 0x142   : > { %1338 = vrot.lane.b32.xlu1 %v391_v42, %s2309_s30  ;;  %1522 = vrot.lane.b32.xlu0 %v748_v23, %s3452_s29  ;;  %v846_v42 = vcombine.high %v822_v55, %v837_v38  ;;  %v861_v23 = vcombine.low %v829_v29, %v844_v40  ;;  %v862_v35 = vcombine.high %v829_v29, %v844_v40 }
 0x143   : > { %v450_v38 = vcombine.high %v426_v10, %v441_v11  ;;  %v457_v53 = vrot.slane %v449_v39, %v2482_v30  ;;  %v1042_v55 = vrot.slane %v1028_v32, %v2478_v25  ;;  %v1094_v10 = vcombine.high %v218_v60, %v2285_v34 }
 0x144   : > { %v2791_v27 = vrot.slane %v846_v42, %v2482_v30  ;;  %v2814_v20 = vrot.slane %v862_v35, %v2482_v30  ;;  %v1101_v42 = vrot.slane %v218_v60, %v2478_v25  ;;  %v1079_v35 = vcombine.high %v2472_v15, %v2285_v34 }
 0x145   : > { %v464_v48 = vrot.slane %v450_v38, %v2482_v30  ;;  %v481_v46 = vcombine.high %v457_v53, %v2285_v34  ;;  %v1060_v40 = vcombine.high %v1027_v9, %v1042_v55  ;;  %v1108_v13 = vrot.slane %v1094_v10, %v2478_v25 }
 0x146   : > { %1342 = vrot.lane.b32.xlu1 %v415_v31, %s3437_s24  ;;  %1530 = vrot.lane.b32.xlu0 %v2749_v28, %s2286_s18  ;;  %s3457_s24 = smov 80   ;;  %v418_v31 = vcombine.high %v414_v18, %v2285_v34  ;;  %v1152_v10 = vrot.slane %v2474_v19, %v2478_v25 }
 0x14a   : > { %1350 = vrot.lane.b32.xlu1 %v416_v4, %s3439_s26  ;;  %1538 = vrot.lane.b32.xlu0 %v2760_v33, %s2290_s2  ;;  %s3441_s26 = smov 88   ;;  %v2802_v4 = vrot.slane %v861_v23, %v2482_v30 }
 0x14e   : > { %1354 = vrot.lane.b32.xlu1 %v407_v3, %s3457_s24  ;;  %1546 = vrot.lane.b32.xlu0 %v2771_v61, %s2291_s12  ;;  %v1044_v3 = vcombine.high %v2650_v49, %v2672_v22  ;;  %v1059_v49 = vcombine.low %v1027_v9, %v1042_v55  ;;  %v419_v22 = vcombine.high %v2452_v5, %v2285_v34 }
 0x14f   : > { %v1086_v5 = vrot.slane %v2472_v15, %v2478_v25  ;;  %v1093_v55 = vrot.slane %v1079_v35, %v2478_v25  ;;  %v507_v15 = vrot.slane %v2519_v50, %v2478_v25 }
 0x150   : > { %v2824_v1 = vrot.slane %v1044_v3, %v2482_v30  ;;  %v2835_v29 = vrot.slane %v1059_v49, %v2482_v30  ;;  %v433_v11 = vrot.slane %v419_v22, %v2478_v25  ;;  %v492_v49 = vrot.slane %v2454_v6, %v2478_v25 }
 0x151   : > { %v1109_v39 = vcombine.low %v1086_v5, %v1101_v42  ;;  %v1110_v38 = vcombine.high %v1086_v5, %v1101_v42 }
 0x152   : > { %1362 = vrot.lane.b32.xlu1 %v414_v18, %s3441_s26  ;;  %1554 = vrot.lane.b32.xlu0 %v2781_v47, %s2295_s17  ;;  %s3462_s26 = smov 96   ;;  %v448_v18 = vrot.slane %v434_v14, %v2478_v25  ;;  %v515_v22 = vcombine.low %v492_v49, %v507_v15  ;;  %v516_v35 = vcombine.high %v492_v49, %v507_v15 }
 0x153   : > { %v2866_v14 = vrot.slane %v1110_v38, %v2482_v30 }
 0x154   : > { %v465_v23 = vcombine.low %v433_v11, %v448_v18  ;;  %v466_v9 = vcombine.high %v433_v11, %v448_v18  ;;  %v219_v18 = vpop.trf.xlu0  ;;  %v2884_v5 = vrot.slane %v515_v22, %v2482_v30 }
 0x156   : > { %1358 = vrot.lane.b32.xlu1 %v417_v52, %s3456_s5  ;;  %1562 = vrot.lane.b32.xlu0 %v2791_v27, %s2297_s23  ;;  %v482_v52 = vcombine.high %v464_v48, %v2285_v34  ;;  %v473_v32 = vrot.slane %v465_v23, %v2482_v30  ;;  %v480_v60 = vrot.slane %v466_v9, %v2482_v30 }
 0x158   : > { %v483_v3 = vcombine.high %v473_v32, %v2285_v34  ;;  %v484_v11 = vcombine.high %v480_v60, %v2285_v34 }
 0x15a   : > { %1366 = vrot.lane.b32.xlu1 %v418_v31, %s3443_s4  ;;  %1570 = vrot.lane.b32.xlu0 %v2802_v4, %s2303_s3  ;;  %s3445_s4 = smov 104   ;;  %v2846_v31 = vrot.slane %v1060_v40, %v2482_v30 }
 0x15e   : > { %1370 = vrot.lane.b32.xlu1 %v457_v53, %s3462_s26  ;;  %1578 = vrot.lane.b32.xlu0 %v2814_v20, %s2305_s25  ;;  %v2856_v53 = vrot.slane %v1109_v39, %v2482_v30  ;;  %v500_v39 = vcombine.high %v2519_v50, %v2285_v34  ;;  %v530_v50 = vrot.slane %v516_v35, %v2482_v30 }
 0x160   : > { %v514_v9 = vrot.slane %v500_v39, %v2478_v25  ;;  %v1145_v39 = vcombine.high %v2474_v19, %v2285_v34 }
 0x162   : > { %1378 = vrot.lane.b32.xlu1 %v464_v48, %s3445_s4  ;;  %1654 = vrot.lane.b32.xlu0 %v2824_v1, %s2286_s18  ;;  %s3447_s4 = smov 112   ;;  %v1125_v48 = vcombine.low %v1093_v55, %v1108_v13 }
 0x164   : > { %v2875_v40 = vrot.slane %v1125_v48, %v2482_v30 }
 0x166   : > { %1374 = vrot.lane.b32.xlu1 %v481_v46, %s3460_s15  ;;  %1662 = vrot.lane.b32.xlu0 %v2835_v29, %s2290_s2  ;;  %v1126_v46 = vcombine.high %v1093_v55, %v1108_v13  ;;  %v547_v13 = vcombine.high %v2884_v5, %v2285_v34 }
 0x168   : > { %v1140_v23 = vrot.slane %v1126_v46, %v2482_v30  ;;  %v1160_v46 = vcombine.high %v219_v18, %v2285_v34 }
 0x16a   : > { %1382 = vrot.lane.b32.xlu1 %v482_v52, %s3459_s13  ;;  %1670 = vrot.lane.b32.xlu0 %v2846_v31, %s2291_s12  ;;  %v1167_v52 = vrot.slane %v219_v18, %v2478_v25  ;;  %v1144_v55 = vcombine.high %v1140_v23, %v2285_v34  ;;  %v1159_v18 = vrot.slane %v1145_v39, %v2478_v25 }
 0x16c   : > { %v1175_v38 = vcombine.low %v1152_v10, %v1167_v52 }
 0x16e   : > { %1386 = vrot.lane.b32.xlu1 %v473_v32, %s3447_s4  ;;  %1678 = vrot.lane.b32.xlu0 %v2856_v53, %s2295_s17  ;;  %s3454_s4 = smov 120   ;;  %v1183_v15 = vrot.slane %v1175_v38, %v2482_v30  ;;  %v1174_v38 = vrot.slane %v1160_v46, %v2478_v25 }
 0x170   : > { %v1192_v39 = vcombine.high %v1159_v18, %v1174_v38 }
 0x172   : > { %1390 = vrot.lane.b32.xlu1 %v483_v3, %s3461_s16  ;;  %1686 = vrot.lane.b32.xlu0 %v2866_v14, %s2297_s23  ;;  %v485_v3 = vcombine.high %v2454_v6, %v2285_v34  ;;  %v548_v6 = vcombine.high %v530_v50, %v2285_v34 }
 0x174   : > { %v499_v49 = vrot.slane %v485_v3, %v2478_v25  ;;  %v1191_v3 = vcombine.low %v1159_v18, %v1174_v38  ;;  %v1218_v38 = vrot.slane %v2476_v24, %v2478_v25 }
 0x176   : > { %1394 = vrot.lane.b32.xlu1 %v480_v60, %s3454_s4  ;;  %1694 = vrot.lane.b32.xlu0 %v2875_v40, %s2303_s3  ;;  %v531_v60 = vcombine.low %v499_v49, %v514_v9  ;;  %s3500_s4 = smov 76   ;;  %v1199_v46 = vrot.slane %v1191_v3, %v2482_v30 }
 0x178   : > { %v2880_v42 = vpop.permute.xlu1 %1282 }
 0x17a   : > { %1398 = vrot.lane.b32.xlu1 %v484_v11, %s3452_s29  ;;  %1702 = vrot.lane.b32.xlu0 %v1140_v23, %s2305_s25  ;;  %v1176_v11 = vcombine.high %v1152_v10, %v1167_v52  ;;  %v1207_v23 = vcombine.high %v1183_v15, %v2285_v34  ;;  %v532_v10 = vcombine.high %v499_v49, %v514_v9  ;;  %s3499_s29 = smov 20  }
 0x17c   : > { %v2894_v32 = vpop.permute.xlu1 %1278 }
 0x17e   : > { %1402 = vrot.lane.b32.xlu1 %v547_v13, %s3450_s27  ;;  %1706 = vrot.lane.b32.xlu0 %v1144_v55, %s3449_s22  ;;  %s3496_s22 = smov 12   ;;  %s3497_s27 = smov 68   ;;  %v539_v13 = vrot.slane %v531_v60, %v2482_v30  ;;  %v1190_v55 = vrot.slane %v1176_v11, %v2482_v30  ;;  %v546_v60 = vrot.slane %v532_v10, %v2482_v30 }
 0x17f   : > { %v558_v11 = vrot.slane %v2456_v7, %v2478_v25  ;;  %v1206_v10 = vrot.slane %v1192_v39, %v2482_v30 }
 0x180   : > { %v2904_v48 = vpop.permute.xlu1 %1286  ;;  %v549_v19 = vcombine.high %v539_v13, %v2285_v34 }
 0x182   : > { %1406 = vrot.lane.b32.xlu1 %v530_v50, %s2286_s18  ;;  %1710 = vrot.lane.b32.xlu0 %v1183_v15, %s2309_s30  ;;  %s3498_s18 = smov 72   ;;  %v1208_v50 = vcombine.high %v1190_v55, %v2285_v34  ;;  %v573_v15 = vrot.slane %v2525_v54, %v2478_v25  ;;  %v1209_v54 = vcombine.high %v1199_v46, %v2285_v34 }
 0x184   : > { %v2911_v22 = vpop.permute.xlu1 %1290  ;;  %v581_v9 = vcombine.low %v558_v11, %v573_v15  ;;  %v582_v18 = vcombine.high %v558_v11, %v573_v15 }
 0x186   : > { %1410 = vrot.lane.b32.xlu1 %v548_v6, %s3496_s22  ;;  %1714 = vrot.lane.b32.xlu0 %v1207_v23, %s3497_s27  ;;  %v550_v23 = vcombine.high %v546_v60, %v2285_v34  ;;  %v589_v7 = vrot.slane %v581_v9, %v2482_v30 }
 0x188   : > { %v2920_v35 = vpop.permute.xlu1 %1298 }
 0x18a   : > { %1414 = vrot.lane.b32.xlu1 %v539_v13, %s2290_s2  ;;  %1718 = vrot.lane.b32.xlu0 %v1190_v55, %s3498_s18  ;;  %v220_v13 = vpop.trf.xlu0  ;;  %s3501_s2 = smov 28  }
 0x18c   : > { %v2928_v52 = vpop.permute.xlu1 %1294 }
 0x18e   : > { %1418 = vrot.lane.b32.xlu1 %v549_v19, %s3499_s29  ;;  %1722 = vrot.lane.b32.xlu0 %v1208_v50, %s3500_s4  ;;  %v1233_v19 = vrot.slane %v220_v13, %v2478_v25  ;;  %v613_v50 = vcombine.high %v589_v7, %v2285_v34 }
 0x190   : > { %v2936_v6 = vpop.permute.xlu1 %1302 }
 0x192   : > { %1422 = vrot.lane.b32.xlu1 %v546_v60, %s2291_s12  ;;  %1726 = vrot.lane.b32.xlu0 %v1199_v46, %s3457_s24  ;;  %s3502_s12 = smov 88   ;;  %v1241_v60 = vcombine.low %v1218_v38, %v1233_v19  ;;  %v1210_v46 = vcombine.high %v1206_v10, %v2285_v34  ;;  %s3504_s24 = smov 92  }
 0x194   : > { %v2944_v49 = vpop.permute.xlu1 %1306  ;;  %v1249_v39 = vrot.slane %v1241_v60, %v2482_v30 }
 0x196   : > { %1426 = vrot.lane.b32.xlu1 %v550_v23, %s3501_s2  ;;  %1730 = vrot.lane.b32.xlu0 %v1209_v54, %s3456_s5  ;;  %s3503_s5 = smov 36   ;;  %v596_v23 = vrot.slane %v582_v18, %v2482_v30  ;;  %v1226_v54 = vcombine.high %v220_v13, %v2285_v34  ;;  %v1211_v18 = vcombine.high %v2476_v24, %v2285_v34 }
 0x198   : > { %v2950_v55 = vpop.permute.xlu1 %1314  ;;  %v614_v11 = vcombine.high %v596_v23, %v2285_v34  ;;  %v1240_v60 = vrot.slane %v1226_v54, %v2478_v25  ;;  %v1225_v13 = vrot.slane %v1211_v18, %v2478_v25  ;;  %v1077_v25 = vcombine.high %v2835_v29, %v2285_v34 }
 0x19a   : > { %1430 = vrot.lane.b32.xlu1 %v589_v7, %s2295_s17  ;;  %1734 = vrot.lane.b32.xlu0 %v1206_v10, %s3502_s12  ;;  %v1242_v7 = vcombine.high %v1218_v38, %v1233_v19  ;;  %v1273_v10 = vcombine.high %v1249_v39, %v2285_v34  ;;  %s3505_s17 = smov 44   ;;  %v1257_v38 = vcombine.low %v1225_v13, %v1240_v60 }
 0x19c   : > { %v2959_v3 = vpop.permute.xlu1 %1310 }
 0x19e   : > { %1434 = vrot.lane.b32.xlu1 %v613_v50, %s3503_s5  ;;  %1738 = vrot.lane.b32.xlu0 %v1210_v46, %s3504_s24  ;;  %v1256_v46 = vrot.slane %v1242_v7, %v2482_v30 }
 0x1a0   : > { %v2965_v9 = vpop.permute.xlu1 %1318  ;;  %v1274_v24 = vcombine.high %v1256_v46, %v2285_v34 }
 0x1a2   : > { %1438 = vrot.lane.b32.xlu1 %v596_v23, %s2297_s23  ;;  %1742 = vrot.lane.b32.xlu0 %v1249_v39, %s3462_s26  ;;  %s3506_s23 = smov 104   ;;  %v1265_v39 = vrot.slane %v1257_v38, %v2482_v30  ;;  %v813_v38 = vcombine.high %v2760_v33, %v2285_v34  ;;  %v878_v33 = vcombine.high %v2791_v27, %v2285_v34 }
 0x1a3   : > { %v1075_v27 = vcombine.high %v2698_v8, %v2285_v34 }
 0x1a4   : > { %v2971_v15 = vpop.permute.xlu1 %1322  ;;  %v1275_v54 = vcombine.high %v1265_v39, %v2285_v34 }
 0x1a6   : > { %1442 = vrot.lane.b32.xlu1 %v614_v11, %s3505_s17  ;;  %1746 = vrot.lane.b32.xlu0 %v1273_v10, %s3460_s15  ;;  %v1258_v11 = vcombine.high %v1225_v13, %v1240_v60  ;;  %s3510_s15 = smov 124   ;;  %v812_v13 = vcombine.high %v2749_v28, %v2285_v34  ;;  %v877_v28 = vcombine.high %v2781_v47, %v2285_v34 }
 0x1a8   : > { %v2980_v50 = vpop.permute.xlu1 %1330  ;;  %v1272_v7 = vrot.slane %v1258_v11, %v2482_v30 }
 0x1aa   : > { %1446 = vrot.lane.b32.xlu1 %v2541_v2, %s2303_s3  ;;  %1750 = vrot.lane.b32.xlu0 %v1256_v46, %s3506_s23  ;;  %s3507_s3 = smov 112   ;;  %v1276_v10 = vcombine.high %v1272_v7, %v2285_v34  ;;  %v811_v46 = vcombine.high %v2587_v51, %v2285_v34 }
 0x1ac   : > { %v2988_v19 = vpop.permute.xlu1 %1326 }
 0x1ae   : > { %1454 = vrot.lane.b32.xlu1 %v2550_v26, %s2305_s25  ;;  %1754 = vrot.lane.b32.xlu0 %v1274_v24, %s3459_s13  ;;  %s3508_s25 = smov 80   ;;  %s3509_s13 = smov 120  }
 0x1b0   : > { %v2994_v23 = vpop.permute.xlu1 %1334 }
 0x1b2   : > { %1462 = vrot.lane.b32.xlu1 %v2573_v43, %s2309_s30  ;;  %1758 = vrot.lane.b32.xlu0 %v1265_v39, %s3507_s3  ;;  %v814_v39 = vcombine.high %v2771_v61, %v2285_v34  ;;  %v879_v61 = vcombine.high %v2802_v4, %v2285_v34 }
 0x1b4   : > { %v3000_v2 = vpop.permute.xlu1 %1338 }
 0x1b6   : > { %1470 = vrot.lane.b32.xlu1 %v2596_v56, %s3498_s18  ;;  %1762 = vrot.lane.b32.xlu0 %v1275_v54, %s3461_s16  ;;  %s3511_s16 = smov 4  }
 0x1b8   : > { %v3006_v26 = vpop.permute.xlu1 %1342 }
 0x1ba   : > { %1478 = vrot.lane.b32.xlu1 %v2627_v21, %s3508_s25  ;;  %1766 = vrot.lane.b32.xlu0 %v1272_v7, %s3509_s13  ;;  %v3026_v21 = vpop.permute.xlu0 %1346 }
 0x1bc   : > { %v3012_v43 = vpop.permute.xlu1 %1350 }
 0x1be   : > { %1486 = vrot.lane.b32.xlu1 %v2640_v17, %s3502_s12  ;;  %1770 = vrot.lane.b32.xlu0 %v1276_v10, %s3510_s15  ;;  %v3032_v17 = vpop.permute.xlu0 %1450 }
 0x1c0   : > { %v3018_v56 = vpop.permute.xlu1 %1354 }
 0x1c2   : > { %1494 = vrot.lane.b32.xlu1 %v2677_v57, %s3462_s26  ;;  %s3513_s26 = smov 52  }
 0x1c4   : > { %v3022_v30 = vpop.permute.xlu1 %1362 }
 0x1c6   : > { %1502 = vrot.lane.b32.xlu1 %v2704_v45, %s3506_s23  ;;  %v3042_v45 = vpop.permute.xlu0 %1458 }
 0x1c8   : > { %v3028_v18 = vpop.permute.xlu1 %1358 }
 0x1ca   : > { %1510 = vrot.lane.b32.xlu1 %v2715_v62, %s3507_s3 }
 0x1cc   : > { %v3034_v60 = vpop.permute.xlu1 %1366 }
 0x1ce   : > { %1518 = vrot.lane.b32.xlu1 %v2727_v16, %s3509_s13  ;;  %v3052_v16 = vpop.permute.xlu0 %1466 }
 0x1d0   : > { %v3038_v57 = vpop.permute.xlu1 %1370 }
 0x1d2   : > { %1526 = vrot.lane.b32.xlu1 %v811_v46, %s3511_s16  ;;  %v3061_v54 = vpop.permute.xlu0 %1474 }
 0x1d4   : > { %v3047_v62 = vpop.permute.xlu1 %1378 }
 0x1d6   : > { %1534 = vrot.lane.b32.xlu1 %v812_v13, %s3496_s22  ;;  %v3071_v10 = vpop.permute.xlu0 %1482 }
 0x1d8   : > { %v3054_v24 = vpop.permute.xlu1 %1374 }
 0x1da   : > { %1542 = vrot.lane.b32.xlu1 %v813_v38, %s3499_s29  ;;  %v3080_v38 = vpop.permute.xlu0 %1490 }
 0x1dc   : > { %v3059_v11 = vpop.permute.xlu1 %1382 }
 0x1de   : > { %1550 = vrot.lane.b32.xlu1 %v814_v39, %s3501_s2  ;;  %v3088_v39 = vpop.permute.xlu0 %1498 }
 0x1e0   : > { %v3066_v7 = vpop.permute.xlu1 %1386 }
 0x1e2   : > { %1558 = vrot.lane.b32.xlu1 %v877_v28, %s3503_s5 }
 0x1e4   : > { %v3073_v46 = vpop.permute.xlu1 %1390 }
 0x1e6   : > { %1566 = vrot.lane.b32.xlu1 %v878_v33, %s3505_s17  ;;  %v1076_v33 = vcombine.high %v2824_v1, %v2285_v34 }
 0x1e8   : > { %v3078_v13 = vpop.permute.xlu1 %1394 }
 0x1e9   : > { %3512 = vst [vmem:[#allocation12_spill] sm:$0xff] %v3078_v13 }
 0x1ea   : > { %1574 = vrot.lane.b32.xlu1 %v879_v61, %s3513_s26  ;;  %v3095_v61 = vpop.permute.xlu0 %1506 }
 0x1ec   : > { %v3083_v47 = vpop.permute.xlu1 %1398 }
 0x1ed   : > { %3514 = vst [vmem:[#allocation13_spill] sm:$0xff] %v3083_v47  ;;  %v1142_v47 = vcombine.high %v2866_v14, %v2285_v34 }
 0x1ee   : > { %1650 = vrot.lane.b32.xlu1 %v1075_v27, %s3511_s16  ;;  %v1078_v27 = vcombine.high %v2846_v31, %v2285_v34  ;;  %v3101_v8 = vpop.permute.xlu0 %1514  ;;  %s3518_s16 = smov 100  }
 0x1f0   : > { %v1403_v28 = vpop.permute.xlu1 %1402 }
 0x1f1   : > { %v1835_v29 = vsel %vm1773_vm0, %v2884_v5, %v1403_v28  ;;  %v1143_v28 = vcombine.high %v2875_v40, %v2285_v34 }
 0x1f2   : > { %1658 = vrot.lane.b32.xlu1 %v1076_v33, %s3496_s22  ;;  %v1141_v33 = vcombine.high %v2856_v53, %v2285_v34  ;;  %v3114_v13 = vpop.permute.xlu0 %1522  ;;  %s3519_s22 = smov 108  }
 0x1f4   : > { %v1407_v4 = vpop.permute.xlu1 %1406 }
 0x1f6   : > { %1666 = vrot.lane.b32.xlu1 %v1077_v25, %s3499_s29  ;;  %v1836_v25 = vsel %vm1775_vm1, %v1835_v29, %v1407_v4  ;;  %v3121_v4 = vpop.permute.xlu0 %1530  ;;  %s3515_s29 = smov 60  }
 0x1f8   : > { %v1411_v58 = vpop.permute.xlu1 %1410 }
 0x1f9   : > { %v1837_v31 = vsel %vm1777_vm2, %v1836_v25, %v1411_v58  ;;  %v943_v25 = vcombine.high %v2643_v41, %v2285_v34 }
 0x1fa   : > { %1674 = vrot.lane.b32.xlu1 %v1078_v27, %s3501_s2  ;;  %v3128_v40 = vpop.permute.xlu0 %1538 }
 0x1fc   : > { %v1415_v1 = vpop.permute.xlu1 %1414 }
 0x1fd   : > { %v1838_v27 = vsel %vm1779_vm3, %v1837_v31, %v1415_v1 }
 0x1fe   : > { %1682 = vrot.lane.b32.xlu1 %v1141_v33, %s3503_s5  ;;  %v3136_v31 = vpop.permute.xlu0 %1546 }
 0x200   : > { %v1419_v51 = vpop.permute.xlu1 %1418 }
 0x201   : > { %v1839_v53 = vsel %vm1781_vm4, %v1838_v27, %v1419_v51  ;;  %v880_v51 = vcombine.high %v2814_v20, %v2285_v34 }
 0x202   : > { %1690 = vrot.lane.b32.xlu1 %v1142_v47, %s3505_s17  ;;  %s2317_s17 = smov [#allocation5]  }
 0x204   : > { %v1423_v5 = vpop.permute.xlu1 %1422 }
 0x205   : > { %v1840_v58 = vsel %vm1783_vm5, %v1839_v53, %v1423_v5  ;;  %v1774_v5 = vsel %vm1773_vm0, %v2489_v37, %v2894_v32 }
 0x206   : > { %1698 = vrot.lane.b32.xlu1 %v1143_v28, %s3513_s26 }
 0x208   : > { %v1427_v1 = vpop.permute.xlu1 %1426 }
 0x209   : > { %v1841_v14 = vsel %vm1785_vm6, %v1840_v58, %v1427_v1  ;;  %v1776_v58 = vsel %vm1775_vm1, %v1774_v5, %v2880_v42 }
 0x20a   : > { %1582 = vrot.lane.b32.xlu1 %v880_v51, %s3515_s29  ;;  %v1778_v51 = vsel %vm1777_vm2, %v1776_v58, %v2904_v48 }
 0x20b   : > { %v1780_v37 = vsel %vm1779_vm3, %v1778_v51, %v2911_v22 }
 0x20c   : > { %v1431_v47 = vpop.permute.xlu1 %1430  ;;  %v1782_v32 = vsel %vm1781_vm4, %v1780_v37, %v2928_v52 }
 0x20d   : > { %v1842_v33 = vsel %vm3469_vm7, %v1841_v14, %v1431_v47  ;;  %v3151_v14 = vpop.permute.xlu0 %1554  ;;  %v1784_v42 = vsel %vm1783_vm5, %v1782_v32, %v2920_v35 }
 0x20e   : > { %1586 = vrot.lane.b32.xlu1 %v2643_v41, %s2309_s30  ;;  %v944_v41 = vcombine.high %v2646_v44, %v2285_v34  ;;  %v1786_v48 = vsel %vm1785_vm6, %v1784_v42, %v2936_v6  ;;  %s3517_s30 = smov 96  }
 0x210   : > { %v1435_v29 = vpop.permute.xlu1 %1434 }
 0x211   : > { %v1843_v20 = vsel %vm3468_vm8, %v1842_v33, %v1435_v29  ;;  %v3165_v33 = vpop.permute.xlu0 %1562  ;;  %v945_v29 = vcombine.high %v2662_v0, %v2285_v34 }
 0x212   : > { %1590 = vrot.lane.b32.xlu1 %v943_v25, %s3497_s27  ;;  %v1788_v25 = vsel %vm3469_vm7, %v1786_v48, %v2944_v49  ;;  %s3516_s27 = smov 84   ;;  %vm1807_vm7 = vcmask 588800  }
 0x213   : > { %v1790_v35 = vsel %vm3468_vm8, %v1788_v25, %v2959_v3  ;;  %vm3474_vm8 = vcmask 556032  }
 0x214   : > { %v1439_v27 = vpop.permute.xlu1 %1438 }
 0x215   : > { %v1844_v53 = vsel %vm1791_vm9, %v1843_v20, %v1439_v27 }
 0x216   : > { %1594 = vrot.lane.b32.xlu1 %v2646_v44, %s3498_s18 }
 0x218   : > { %v1443_v28 = vpop.permute.xlu1 %1442 }
 0x219   : > { %v1845_v1 = vsel %vm1793_vm10, %v1844_v53, %v1443_v28  ;;  %v3184_v53 = vpop.permute.xlu0 %1570 }
 0x21a   : > { %1598 = vrot.lane.b32.xlu1 %v944_v41, %s3500_s4 }
 0x21c   : > { %v1447_v44 = vpop.permute.xlu1 %1446 }
 0x21d   : > { %v1846_v47 = vsel %vm3470_vm11, %v1845_v1, %v1447_v44 }
 0x21e   : > { %1602 = vrot.lane.b32.xlu1 %v2662_v0, %s3508_s25  ;;  %v1847_v52 = vsel %vm3471_vm12, %v1846_v47, %v3032_v17  ;;  %v1792_v17 = vsel %vm1791_vm9, %v1790_v35, %v2950_v55  ;;  %v1011_v35 = vcombine.high %v2695_v36, %v2285_v34 }
 0x21f   : > { %v1794_v49 = vsel %vm1793_vm10, %v1792_v17, %v2965_v9  ;;  %v946_v9 = vcombine.high %v2680_v59, %v2285_v34  ;;  %v3521_v17 = vld [vmem:[#allocation13_spill] sm:$0xff] }
 0x220   : > { %v1455_v22 = vpop.permute.xlu1 %1454  ;;  %v1796_v3 = vsel %vm3470_vm11, %v1794_v49, %v2971_v15  ;;  %vm3476_vm11 = vcmask 621568   ;;  %v3523_v49 = vld [vmem:[#allocation9_spill] sm:$0xff] }
 0x221   : > { %v1848_v20 = vsel %vm3472_vm13, %v1847_v52, %v1455_v22 }
 0x222   : > { %1606 = vrot.lane.b32.xlu1 %v945_v29, %s3516_s27  ;;  %v1849_v27 = vsel %vm3473_vm14, %v1848_v20, %v3042_v45  ;;  %v1798_v45 = vsel %vm3471_vm12, %v1796_v3, %v2988_v19  ;;  %vm3480_vm12 = vcmask 654336   ;;  %v3202_v19 = vpop.permute.xlu0 %1578 }
 0x223   : > { %v1800_v41 = vsel %vm3472_vm13, %v1798_v45, %v2980_v50  ;;  %vm3477_vm13 = vcmask 687104   ;;  %v3524_v45 = vld [vmem:[#allocation11_spill] sm:$0xff] }
 0x224   : > { %v1463_v6 = vpop.permute.xlu1 %1462  ;;  %v1802_v15 = vsel %vm3473_vm14, %v1800_v41, %v2994_v23  ;;  %vm3479_vm14 = vcmask 719872  }
 0x225   : > { %v1850_v0 = vsel %vm3475_vm15, %v1849_v27, %v1463_v6 }
 0x226   : > { %1610 = vrot.lane.b32.xlu1 %v2680_v59, %s3502_s12  ;;  %v1851_v55 = vsel %vm3474_vm8, %v1850_v0, %v3052_v16  ;;  %v1804_v59 = vsel %vm3475_vm15, %v1802_v15, %v3000_v2  ;;  %v3222_v32 = vpop.permute.xlu0 %1654  ;;  %vm3481_vm15 = vcmask 785408  }
 0x227   : > { %v1806_v51 = vsel %vm3474_vm8, %v1804_v59, %v3006_v26  ;;  %vm3478_vm8 = vcmask 752640  }
 0x228   : > { %v1471_v5 = vpop.permute.xlu1 %1470  ;;  %v1808_v2 = vsel %vm1807_vm7, %v1806_v51, %v3026_v21 }
 0x229   : > { %v1852_v28 = vsel %vm1807_vm7, %v1851_v55, %v1471_v5  ;;  %v1810_v26 = vsel %vm3476_vm11, %v1808_v2, %v3012_v43 }
 0x22a   : > { %1614 = vrot.lane.b32.xlu1 %v946_v9, %s3504_s24  ;;  %v1853_v16 = vsel %vm3476_vm11, %v1852_v28, %v3061_v54  ;;  %v1009_v54 = vcombine.high %v2683_v63, %v2285_v34  ;;  %v1812_v44 = vsel %vm3480_vm12, %v1810_v26, %v3018_v56  ;;  %vm3482_vm11 = vcmask 818176   ;;  %v3238_v42 = vpop.permute.xlu0 %1662  ;;  %s3522_s24 = smov 116  }
 0x22c   : > { %v1479_v58 = vpop.permute.xlu1 %1478 }
 0x22d   : > { %v1854_v1 = vsel %vm3480_vm12, %v1853_v16, %v1479_v58  ;;  %vm3485_vm12 = vcmask 949248  }
 0x22e   : > { %1618 = vrot.lane.b32.xlu1 %v2683_v63, %s3517_s30  ;;  %v1855_v23 = vsel %vm3477_vm13, %v1854_v1, %v3071_v10  ;;  %v1814_v10 = vsel %vm3477_vm13, %v1812_v44, %v3028_v18  ;;  %vm1823_vm13 = vcmask 850944   ;;  %v1671_v25 = vpop.permute.xlu0 %1670 }
 0x22f   : > { %v1816_v43 = vsel %vm3479_vm14, %v1814_v10, %v3022_v30 }
 0x230   : > { %v1487_v50 = vpop.permute.xlu1 %1486  ;;  %v1818_v56 = vsel %vm3478_vm8, %v1816_v43, %v3034_v60 }
 0x231   : > { %v1856_v37 = vsel %vm3479_vm14, %v1855_v23, %v1487_v50  ;;  %v1820_v22 = vsel %vm3481_vm15, %v1818_v56, %v3038_v57  ;;  %vm3486_vm14 = vcmask 916480  }
 0x232   : > { %1622 = vrot.lane.b32.xlu1 %v1009_v54, %s3518_s16  ;;  %v1857_v21 = vsel %vm3478_vm8, %v1856_v37, %v3080_v38  ;;  %v1010_v38 = vcombine.high %v2686_v12, %v2285_v34  ;;  %v1822_v30 = vsel %vm3482_vm11, %v1820_v22, %v3054_v24  ;;  %vm1825_vm8 = vcmask 883712  }
 0x234   : > { %v1495_v63 = vpop.permute.xlu1 %1494 }
 0x235   : > { %v1858_v47 = vsel %vm3481_vm15, %v1857_v21, %v1495_v63  ;;  %vm3484_vm15 = vcmask 982016  }
 0x236   : > { %1626 = vrot.lane.b32.xlu1 %v2686_v12, %s3506_s23  ;;  %v1859_v48 = vsel %vm3482_vm11, %v1858_v47, %v3088_v39  ;;  %v1824_v39 = vsel %vm1823_vm13, %v1822_v30, %v3047_v62  ;;  %vm3483_vm11 = vcmask 1014784   ;;  %s2199_s23 = sshll.u32 %s2317_s17, 4  ;;  %s2200_s23 = int_to_ptr.vmem [resolvable:$false] %s2199_s23 }
 0x237   : > { %v1826_v57 = vsel %vm1825_vm8, %v1824_v39, %v3059_v11  ;;  %v3520_v11 = vld [vmem:[#allocation12_spill] sm:$0xff] }
 0x238   : > { %v1503_v18 = vpop.permute.xlu1 %1502  ;;  %v1828_v24 = vsel %vm3486_vm14, %v1826_v57, %v3066_v7 }
 0x239   : > { %v1860_v52 = vsel %vm1823_vm13, %v1859_v48, %v1503_v18  ;;  %v3529_v18 = vld [vmem:[#allocation10_spill] sm:$0xff] }
 0x23a   : > { %1630 = vrot.lane.b32.xlu1 %v1010_v38, %s3519_s22  ;;  %v1861_v29 = vsel %vm1825_vm8, %v1860_v52, %v3095_v61  ;;  %v1830_v61 = vsel %vm3485_vm12, %v1828_v24, %v3073_v46  ;;  %v1679_v46 = vpop.permute.xlu0 %1678 }
 0x23b   : > { %v1832_v6 = vsel %vm3484_vm15, %v1830_v61, %v3520_v11 }
 0x23c   : > { %v1511_v60 = vpop.permute.xlu1 %1510  ;;  %v3272_v0 = vsel %vm3483_vm11, %v1832_v6, %v3521_v17 }
 0x23d   : > { %v1862_v12 = vsel %vm3486_vm14, %v1861_v29, %v1511_v60  ;;  %vm3528_vm14 = vcmask 424960  }
 0x23e   : > { %1634 = vrot.lane.b32.xlu1 %v2695_v36, %s3507_s3  ;;  %v1863_v62 = vsel %vm3485_vm12, %v1862_v12, %v3101_v8  ;;  %v1687_v28 = vpop.permute.xlu0 %1686  ;;  %vm3527_vm12 = vcmask 392192   ;;  %s2201_s3 = scalar_lea.vmem %s2200_s23, 256 }
 0x240   : > { %v1519_v20 = vpop.permute.xlu1 %1518 }
 0x241   : > { %v1864_v27 = vsel %vm3484_vm15, %v1863_v62, %v1519_v20  ;;  %vm3526_vm15 = vcmask 293888  }
 0x242   : > { %v3276_v7 = vsel %vm3483_vm11, %v1864_v27, %v3114_v13  ;;  %1638 = vrot.lane.b32.xlu1 %v1011_v35, %s3522_s24  ;;  %v1012_v13 = vcombine.high %v3524_v45, %v2285_v34  ;;  %v1695_v16 = vpop.permute.xlu0 %1694  ;;  %vm3525_vm11 = vcmask 261120  }
 0x243   : > { %v1932_v8 = vcombine.low %v3272_v0, %v3276_v7 }
 0x244   : > { %v1527_v36 = vpop.permute.xlu1 %1526 }
 0x245   : > { %v1866_v3 = vsel %vm1773_vm0, %v3523_v49, %v1527_v36 }
 0x246   : > { %1642 = vrot.lane.b32.xlu1 %v3524_v45, %s3509_s13  ;;  %v1867_v55 = vsel %vm1775_vm1, %v1866_v3, %v3121_v4  ;;  %v1703_v23 = vpop.permute.xlu0 %1702  ;;  %s2065_s13 = sshll.u32 %s2269_s9, 7  ;;  %s1952_s9 = scalar_lea.sflag [#allocation4], %s2438_s28 }
 0x247   : > { %s3370_s2 = scalar_lea.hbm %s3420_s1, %s2065_s13 }
 0x248   : > { %v1535_v5 = vpop.permute.xlu1 %1534 }
 0x249   : > { %v1868_v9 = vsel %vm1777_vm2, %v1867_v55, %v1535_v5 }
 0x24a   : > { %1646 = vrot.lane.b32.xlu1 %v1012_v13, %s3510_s15  ;;  %v1869_v15 = vsel %vm1779_vm3, %v1868_v9, %v3128_v40  ;;  %v1707_v37 = vpop.permute.xlu0 %1706  ;;  %s3564_s15 = sshll.u32 %s2438_s28, 3 }
 0x24b   : > { %s152_s26 = scalar_lea.vmem [#allocation5], %s3564_s15 }
 0x24c   : > { %v1543_v41 = vpop.permute.xlu1 %1542  ;;  %s1968_s4 = sshll.u32 %s152_s26, 4  ;;  %s3372_s4 = int_to_ptr.vmem [resolvable:$true] %s1968_s4 }
 0x24d   : > { %v1870_v58 = vsel %vm1781_vm4, %v1869_v15, %v1543_v41  ;;  %s2195_s12 = scalar_lea.vmem %s3372_s4, 128  ;;  %p2202_p10 = scmp.lt.s32.totalorder %s3372_s4, %s2200_s23 }
 0x24e   : > { %v1871_v1 = vsel %vm1783_vm5, %v1870_v58, %v3136_v31  ;;  %v1711_v63 = vpop.permute.xlu0 %1710  ;;  %p2196_p8 = scmp.ne.s32.totalorder %s3372_s4, %s2195_s12  ;;  %p2203_p13 = scmp.lt.s32.totalorder %s2201_s3, %s2195_s12 }
 0x250   : > { %v1551_v59 = vpop.permute.xlu1 %1550  ;;  %p2197_p11 = pnand %p2196_p8, %p3566_p9  ;;  %p2204_p1 = por %p2203_p13, %p2202_p10 }
 0x251   : > { %v1872_v4 = vsel %vm1785_vm6, %v1871_v1, %v1551_v59 }
 0x252   : > { %v1873_v34 = vsel %vm3525_vm11, %v1872_v4, %v3151_v14  ;;  %v1715_v14 = vpop.permute.xlu0 %1714  ;;  %p2198_p0 = pneg %p2197_p11 }
 0x254   : > { %v1559_v51 = vpop.permute.xlu1 %1558  ;;  %p2205_p3 = pnand %p2204_p1, %p2198_p0 }
 0x255   : > { %v1874_v50 = vsel %vm3526_vm15, %v1873_v34, %v1559_v51 }
 0x256   : > { %v1875_v40 = vsel %vm1791_vm9, %v1874_v50, %v3165_v33  ;;  %v1719_v56 = vpop.permute.xlu0 %1718 }
 0x258   : > { %v1567_v54 = vpop.permute.xlu1 %1566 }
 0x259   : > { %v1876_v2 = vsel %vm1793_vm10, %v1875_v40, %v1567_v54 }
 0x25a   : > { %v1877_v31 = vsel %vm3527_vm12, %v1876_v2, %v3184_v53  ;;  %v1723_v52 = vpop.permute.xlu0 %1722 }
 0x25c   : > { %v1575_v26 = vpop.permute.xlu1 %1574 }
 0x25d   : > { %v1878_v44 = vsel %vm3528_vm14, %v1877_v31, %v1575_v26 }
 0x25e   : > { %v1727_v39 = vpop.permute.xlu0 %1726 }
 0x260   : > { %v1651_v10 = vpop.permute.xlu1 %1650 }
 0x261   : > { %v1897_v48 = vsel %vm1773_vm0, %v3529_v18, %v1651_v10  ;;  %vm3530_vm0 = vmmov %vm3525_vm11 }
 0x262   : > { %v1898_v38 = vsel %vm1775_vm1, %v1897_v48, %v3222_v32  ;;  %vm3531_vm11 = vmmov %vm3526_vm15  ;;  %v1731_v20 = vpop.permute.xlu0 %1730  ;;  %vm3542_vm15 = vcmask 752640  }
 0x263   : > { %vm3532_vm1 = vmmov %vm3527_vm12  ;;  %vm3540_vm12 = vcmask 687104  }
 0x264   : > { %v1659_v21 = vpop.permute.xlu1 %1658 }
 0x265   : > { %v1899_v22 = vsel %vm1777_vm2, %v1898_v38, %v1659_v21  ;;  %vm3533_vm2 = vmmov %vm3528_vm14  ;;  %vm3541_vm14 = vcmask 719872  }
 0x266   : > { %v1900_v30 = vsel %vm1779_vm3, %v1899_v22, %v3238_v42  ;;  %v1735_v6 = vpop.permute.xlu0 %1734  ;;  %vm3534_vm3 = vcmask 457728  }
 0x268   : > { %v1667_v47 = vpop.permute.xlu1 %1666 }
 0x269   : > { %v1901_v60 = vsel %vm1781_vm4, %v1900_v30, %v1667_v47  ;;  %vm3535_vm4 = vcmask 490496  }
 0x26a   : > { %v1902_v12 = vsel %vm1783_vm5, %v1901_v60, %v1671_v25  ;;  %v1739_v49 = vpop.permute.xlu0 %1738  ;;  %vm3536_vm5 = vcmask 523264  }
 0x26c   : > { %v1675_v43 = vpop.permute.xlu1 %1674 }
 0x26d   : > { %v1903_v57 = vsel %vm1785_vm6, %v1902_v12, %v1675_v43  ;;  %vm3537_vm6 = vcmask 556032  }
 0x26e   : > { %v1904_v61 = vsel %vm3530_vm0, %v1903_v57, %v1679_v46  ;;  %v1743_v55 = vpop.permute.xlu0 %1742  ;;  %vm3543_vm0 = vcmask 785408  }
 0x270   : > { %v1683_v33 = vpop.permute.xlu1 %1682 }
 0x271   : > { %v1905_v32 = vsel %vm3531_vm11, %v1904_v61, %v1683_v33  ;;  %vm3544_vm11 = vcmask 818176  }
 0x272   : > { %v1906_v35 = vsel %vm1791_vm9, %v1905_v32, %v1687_v28  ;;  %v1747_v41 = vpop.permute.xlu0 %1746  ;;  %vm3538_vm9 = vcmask 621568  }
 0x274   : > { %v1691_v53 = vpop.permute.xlu1 %1690 }
 0x275   : > { %v1907_v11 = vsel %vm1793_vm10, %v1906_v35, %v1691_v53  ;;  %vm3539_vm10 = vcmask 654336  }
 0x276   : > { %v1908_v27 = vsel %vm3532_vm1, %v1907_v11, %v1695_v16  ;;  %v1751_v1 = vpop.permute.xlu0 %1750  ;;  %vm3545_vm1 = vmmov %vm3534_vm3 }
 0x277   : > { %v1879_v31 = vsel %vm3545_vm1, %v1878_v44, %v3202_v19  ;;  %vm3559_vm1 = vcmask 982016  }
 0x278   : > { %v1699_v29 = vpop.permute.xlu1 %1698 }
 0x279   : > { %v1909_v17 = vsel %vm3533_vm2, %v1908_v27, %v1699_v29  ;;  %vm3546_vm2 = vmmov %vm3535_vm4 }
 0x27a   : > { %v1910_v36 = vsel %vm3534_vm3, %v1909_v17, %v1703_v23  ;;  %v1755_v50 = vpop.permute.xlu0 %1754  ;;  %vm3547_vm3 = vmmov %vm3536_vm5  ;;  %v3565_v17 = vld [vmem:[#allocation8_spill] sm:$0xff] }
 0x27b   : > { %v1911_v46 = vsel %vm3535_vm4, %v1910_v36, %v1707_v37  ;;  %vm3548_vm4 = vmmov %vm3537_vm6 }
 0x27c   : > { %v1583_v24 = vpop.permute.xlu1 %1582  ;;  %v1912_v45 = vsel %vm3536_vm5, %v1911_v46, %v1711_v63  ;;  %vm3549_vm5 = vmmov %vm3538_vm9 }
 0x27d   : > { %v1913_v13 = vsel %vm3537_vm6, %v1912_v45, %v1715_v14  ;;  %v1880_v63 = vsel %vm3546_vm2, %v1879_v31, %v1583_v24  ;;  %vm3550_vm6 = vmmov %vm3539_vm10 }
 0x27e   : > { %v1914_v28 = vsel %vm1807_vm7, %v1913_v13, %v1719_v56  ;;  %v1759_v37 = vpop.permute.xlu0 %1758 }
 0x27f   : > { %v1915_v58 = vsel %vm3538_vm9, %v1914_v28, %v1723_v52  ;;  %vm3551_vm9 = vmmov %vm3540_vm12 }
 0x280   : > { %v1587_v62 = vpop.permute.xlu1 %1586  ;;  %v1916_v16 = vsel %vm3539_vm10, %v1915_v58, %v1727_v39  ;;  %vm3552_vm10 = vmmov %vm3541_vm14 }
 0x281   : > { %v1917_v4 = vsel %vm3540_vm12, %v1916_v16, %v1731_v20  ;;  %v1881_v21 = vsel %vm3547_vm3, %v1880_v63, %v1587_v62  ;;  %vm3553_vm12 = vcmask 916480   ;;  %vm3561_vm3 = vmmov %vm3559_vm1 }
 0x282   : > { %v1918_v34 = vsel %vm3541_vm14, %v1917_v4, %v1735_v6  ;;  %v1763_v43 = vpop.permute.xlu0 %1762  ;;  %vm3554_vm14 = vmmov %vm3542_vm15 }
 0x283   : > { %v1919_v54 = vsel %vm3542_vm15, %v1918_v34, %v1739_v49  ;;  %vm3555_vm15 = vmmov %vm3543_vm0 }
 0x284   : > { %v1591_v42 = vpop.permute.xlu1 %1590  ;;  %v1920_v2 = vsel %vm3543_vm0, %v1919_v54, %v1743_v55  ;;  %vm3557_vm0 = vcmask 949248  }
 0x285   : > { %v1921_v26 = vsel %vm3544_vm11, %v1920_v2, %v1747_v41  ;;  %v1882_v47 = vsel %vm3548_vm4, %v1881_v21, %v1591_v42  ;;  %vm3560_vm2 = vmmov %vm3557_vm0  ;;  %vm3562_vm4 = vcmask 1014784  }
 0x286   : > { %v1922_v14 = vsel %vm1823_vm13, %v1921_v26, %v1751_v1  ;;  %v1767_v30 = vpop.permute.xlu0 %1766 }
 0x287   : > { %v1923_v33 = vsel %vm1825_vm8, %v1922_v14, %v1755_v50 }
 0x288   : > { %v1595_v25 = vpop.permute.xlu1 %1594  ;;  %v1924_v52 = vsel %vm3553_vm12, %v1923_v33, %v1759_v37 }
 0x289   : > { %v1883_v56 = vsel %vm1807_vm7, %v1882_v47, %v1595_v25  ;;  %vm3556_vm7 = vmmov %vm3544_vm11  ;;  %v1925_v39 = vsel %vm3557_vm0, %v1924_v52, %v1763_v43  ;;  %v1940_v25 = vrot.slane %v1932_v8, %v3565_v17 }
 0x28a   : > { %vm3558_vm11 = vmmov %vm3553_vm12  ;;  %v1926_v32 = vsel %vm3559_vm1, %v1925_v39, %v1767_v30  ;;  %v1771_v62 = vpop.permute.xlu0 %1770 }
 0x28c   : > { %v1599_v3 = vpop.permute.xlu1 %1598 }
 0x28d   : > { %v1884_v48 = vsel %vm3549_vm5, %v1883_v56, %v1599_v3  ;;  %vm3563_vm5 = vmmov %vm3562_vm4 }
 0x28e   : > { %v1927_v6 = vsel %vm3563_vm5, %v1926_v32, %v1771_v62 }
 0x290   : > { %v1603_v5 = vpop.permute.xlu1 %1602 }
 0x291   : > { %v1885_v38 = vsel %vm3550_vm6, %v1884_v48, %v1603_v5 }
 0x294   : > { %v1607_v9 = vpop.permute.xlu1 %1606 }
 0x295   : > { %v1886_v19 = vsel %vm3551_vm9, %v1885_v38, %v1607_v9 }
 0x298   : > { %v1611_v15 = vpop.permute.xlu1 %1610 }
 0x299   : > { %v1887_v44 = vsel %vm3552_vm10, %v1886_v19, %v1611_v15 }
 0x29c   : > { %v1615_v59 = vpop.permute.xlu1 %1614 }
 0x29d   : > { %v1888_v53 = vsel %vm3554_vm14, %v1887_v44, %v1615_v59 }
 0x2a0   : > { %v1619_v51 = vpop.permute.xlu1 %1618 }
 0x2a1   : > { %v1889_v60 = vsel %vm3555_vm15, %v1888_v53, %v1619_v51 }
 0x2a4   : > { %v1623_v23 = vpop.permute.xlu1 %1622 }
 0x2a5   : > { %v1890_v29 = vsel %vm3556_vm7, %v1889_v60, %v1623_v23 }
 0x2a8   : > { %v1627_v40 = vpop.permute.xlu1 %1626 }
 0x2a9   : > { %v1891_v12 = vsel %vm1823_vm13, %v1890_v29, %v1627_v40 }
 0x2ac   : > { %v1631_v10 = vpop.permute.xlu1 %1630 }
 0x2ad   : > { %v1892_v24 = vsel %vm1825_vm8, %v1891_v12, %v1631_v10 }
 0x2b0   : > { %v1635_v18 = vpop.permute.xlu1 %1634 }
 0x2b1   : > { %v1893_v61 = vsel %vm3558_vm11, %v1892_v24, %v1635_v18 }
 0x2b4   : > { %v1639_v22 = vpop.permute.xlu1 %1638 }
 0x2b5   : > { %v1894_v20 = vsel %vm3560_vm2, %v1893_v61, %v1639_v22 }
 0x2b8   : > { %v1643_v57 = vpop.permute.xlu1 %1642 }
 0x2b9   : > { %v1895_v35 = vsel %vm3561_vm3, %v1894_v20, %v1643_v57 }
 0x2bc   : > { %v1647_v11 = vpop.permute.xlu1 %1646 }
 0x2bd   : > { %v1896_v42 = vsel %vm3562_vm4, %v1895_v35, %v1647_v11 }
 0x2be   : > { %v1933_v27 = vcombine.low %v1896_v42, %v1927_v6 }
 0x2c0   : > { %v1947_v36 = vrot.slane %v1933_v27, %v3565_v17 }
 0x2c2   : > { %v1948_v49 = vcombine.low %v1940_v25, %v1947_v36 }
 0x2c4   : > { %1950 = vst [vmem:[%s152_s26] sm:$0xff] %v1948_v49 }
 0x2c5   : > { %2208 = shalt.err (!%p2205_p3)
}
 0x2c6   : > { %s2209_s28 = scalar_lea.hbm %s3370_s2, 128  ;;  %s2213_s27 = scalar_lea.hbm %s3420_s1, 256 }
 0x2c7   : > { %p2210_p4 = scmp.ne.s32.totalorder %s3370_s2, %s2209_s28  ;;  %p2214_p12 = scmp.lt.u32.totalorder %s3370_s2, %s3420_s1 }
 0x2c8   : > { %p2215_p2 = scmp.lt.u32.totalorder %s2213_s27, %s2209_s28  ;;  %p2217_p8 = scmp.lt.u32.totalorder %s2209_s28, %s3370_s2 }
 0x2c9   : > { %p2211_p6 = pnand %p2210_p4, %p3566_p9 }
 0x2ca   : > { %p2216_p5 = por %p2215_p2, %p2214_p12 }
 0x2cb   : > { %p2212_p7 = pneg %p2211_p6 }
 0x2cc   : > { %p2218_p11 = por %p2217_p8, %p2216_p5 }
 0x2ce   : > { %p2219_p0 = pnand %p2218_p11, %p2212_p7 }
 0x2d0   : > { %2222 = shalt.err (!%p2219_p0)
}
 0x2d1   : > { %2068 = dma.vmem_to_hbm [thread:$0]  (%p3566_p9), %s3372_s4, 128, %s3370_s2, %s1952_s9  }
 0x2d2 PF: > { %s1980_s22 = sand.u32 1, %s2257_s6   ;;  %p3567_p10 = scmp.ne.s32.totalorder %s3490_s21, 0 }
 0x2d3   : > { %p3568_p13 = scmp.ge.s32.totalorder %s2277_s11, 2  ;;  %s1981_s24 = scalar_lea.sflag [#allocation4], %s1980_s22 }
 0x2d5   : > { %p2075_p1 = pnand %p3568_p13, %p3567_p10 }
 0x2d7   : > { %2252 = dma.done.wait (!%p2075_p1), %s1981_s24, 128  }
 0x2d8   : > { %2254 = vsyncadd (!%p2075_p1), %s1981_s24, 4294967168  ;;  %s17_s11 = sadd.s32 1, %s2277_s11   ;;  %s3569_s6 = smov %s2261_s7 }
 0x2d9   : > { %p14_p3 = scmp.ge.s32.totalorder %s17_s11, 4   ;;  %s3570_s7 = smov %s2265_s8 }
 0x2da   : > { %s3571_s8 = smov %s2384_s20  ;;  %s3572_s9 = smov %s2273_s10 }
 0x2db   : > { %s3573_s10 = smov %s3575_s14  ;;  %16 = sbr.rel (!%p14_p3) target bundleno = 6 (0x6), region = 69 }
 0x2e2   :  { %1986 = vsyncpa [#allocation3], 1 }
 0x2e3   :  { %1988 = vsyncpa [#allocation3 + $0x1], 1 }
 0x2e4   :  { %1989 = vsyncpa [#allocation4], 1 }
 0x2e5   :  { %1991 = vsyncpa [#allocation4 + $0x1], 1 }

</bundles_post_ra>
